<compile_context>
chip_gen: v7x
topology: tpu7x:2x2x1
jax: 0.10.0
libtpu: 0.0.40
codegen_flags: <defaults>
</compile_context>

<pallas_src>
import jax
import jax.numpy as jnp
from jax.experimental import pallas as pl
from jax.experimental.pallas import tpu as pltpu

LANE = 128          # vreg lane width: hidden/output feature dims padded to this
SUBLANE_BF16 = 16   # bf16 packs 2 rows/sublane -> row tiles are multiples of 16


def _round_up(x, m):
    return ((x + m - 1) // m) * m


# ---------------------------------------------------------------------------
# One-time capability / hardware probes (module level, NOT in the hot path).
# ---------------------------------------------------------------------------
def _probe_buffered():
    try:
        pl.BlockSpec((8, LANE), lambda i: (0, 0), pipeline_mode=pl.Buffered(1))
        return True
    except Exception:
        return False


_HAS_BUFFERED = _probe_buffered()


def _vmem_ceiling_bytes():
    # ~3/4 of physical VMEM per core: ~96 MiB on v5e/v6e (128 MiB),
    # ~48 MiB on v7x (64 MiB). Conservative fallback if the query fails.
    try:
        cap = int(pltpu.get_tpu_info().vmem_capacity_bytes)
    except Exception:
        cap = 64 << 20
    return min((cap * 3) // 4, 100 << 20)


_VMEM_CEILING = _vmem_ceiling_bytes()


# ---------------------------------------------------------------------------
# Kernel
# ---------------------------------------------------------------------------
def mlp_fused_kernel(x_ref, w1_ref, b1_ref, w2_ref, b2_ref, o_ref):
    # Layer 1: bf16 x @ bf16 W1 on the MXU, f32 accumulation. K = d_in stays
    # unpadded; the MXU pads K internally at no HBM cost.
    h = jnp.dot(x_ref[...], w1_ref[...], preferred_element_type=jnp.float32)
    h = jnp.maximum(h + b1_ref[...], 0.0)       # bias + ReLU in f32 on the VPU
    # Dropout(p=0.0) is the identity in forward -> omitted.
    # Layer 2: cast activations to bf16 for the MXU, accumulate in f32.
    # Padding columns of h are ReLU(0 + 0) = 0, so they contribute nothing.
    y = jnp.dot(h.astype(w2_ref.dtype), w2_ref[...],
                preferred_element_type=jnp.float32)
    o_ref[...] = (y + b2_ref[...]).astype(o_ref.dtype)


def _resident_spec(shape):
    # Constant index_map -> block never changes; Pallas skips the re-DMA.
    # Single buffering (when available) halves the VMEM held by the resident
    # weights, which matters most on v7x's 64 MiB VMEM.
    if _HAS_BUFFERED:
        return pl.BlockSpec(shape, lambda i: (0,) * len(shape),
                            pipeline_mode=pl.Buffered(1))
    return pl.BlockSpec(shape, lambda i: (0,) * len(shape))


def _pick_row_tile(M, tm_max=512):
    # Small M: one full-M block (no dummy all-zero tiles; with resident
    # weights and a single real tile there is nothing to pipeline anyway).
    if M <= tm_max:
        return _round_up(M, SUBLANE_BF16)
    # Large M: big tiles to amortize the ~0.35 us/step overhead, but keep
    # >= 4 grid steps so v7x dual-TC sharding still pipelines per core.
    tm = tm_max
    while tm > 128 and pl.cdiv(M, tm) < 4:
        tm //= 2
    return tm


# ---------------------------------------------------------------------------
# Parameter preparation (runs ONCE, outside the per-call path)
# ---------------------------------------------------------------------------
def prepare_mlp_params(w1, b1, w2, b2):
    """w1: [d_in, d_hid], b1: [d_hid], w2: [d_hid, d_out], b2: [d_out]
    (weights already transposed to [in, out]).

    Returns padded bf16 weights / f32 biases laid out for the kernel.
    """
    d_in, d_hid = w1.shape
    d_out = w2.shape[1]
    d_hid_p = _round_up(d_hid, LANE)
    d_out_p = _round_up(d_out, LANE)

    cdt = jnp.bfloat16
    # W1's K dim (d_in) is left unpadded to match the unpadded x tiles.
    w1_p = jnp.zeros((d_in, d_hid_p), cdt).at[:, :d_hid].set(w1.astype(cdt))
    w2_p = jnp.zeros((d_hid_p, d_out_p), cdt).at[:d_hid, :d_out].set(w2.astype(cdt))
    b1_p = jnp.zeros((1, d_hid_p), jnp.float32).at[0, :d_hid].set(b1.astype(jnp.float32))
    b2_p = jnp.zeros((1, d_out_p), jnp.float32).at[0, :d_out].set(b2.astype(jnp.float32))
    return w1_p, b1_p, w2_p, b2_p, d_out


# ---------------------------------------------------------------------------
# Forward (jittable end-to-end; only x is padded per call, rows only)
# ---------------------------------------------------------------------------
def mlp_forward(x, w1_p, b1_p, w2_p, b2_p, d_out):
    """x: [M, d_in] f32/bf16. Returns f32 [M, d_out]."""
    M, d_in = x.shape
    d_hid_p = w1_p.shape[1]
    d_out_p = w2_p.shape[1]

    tm = _pick_row_tile(M)
    M_p = _round_up(M, tm)
    grid = (M_p // tm,)

    x_b = x.astype(jnp.bfloat16)
    if M_p != M:
        x_b = jnp.pad(x_b, ((0, M_p - M), (0, 0)))   # rows only; K stays d_in

    # Exact buffer accounting: 1 buffer for Buffered(1) residents (2 if the
    # fallback double-buffers them), 2 buffers for the pipelined x/out tiles,
    # plus an estimate of the f32 hidden intermediate and compiler headroom.
    w_bufs = 1 if _HAS_BUFFERED else 2
    weight_bytes = w_bufs * 2 * (d_in * d_hid_p + d_hid_p * d_out_p)      # bf16
    bias_bytes = w_bufs * 4 * (d_hid_p + d_out_p)                         # f32
    io_bytes = 2 * tm * d_in * 2 + 2 * tm * d_out_p * 4                   # x / out
    hidden_bytes = tm * d_hid_p * 4                                       # f32 h
    need = weight_bytes + bias_bytes + io_bytes + hidden_bytes + (4 << 20)
    vmem_limit = int(min(max(need, 16 << 20), _VMEM_CEILING))

    out_p = pl.pallas_call(
        mlp_fused_kernel,
        out_shape=jax.ShapeDtypeStruct((M_p, d_out_p), jnp.float32),
        grid_spec=pltpu.PrefetchScalarGridSpec(
            num_scalar_prefetch=0,
            grid=grid,
            in_specs=[
                pl.BlockSpec((tm, d_in), lambda i: (i, 0)),   # x row tile (pipelined)
                _resident_spec((d_in, d_hid_p)),              # W1 (resident)
                _resident_spec((1, d_hid_p)),                 # b1 (f32)
                _resident_spec((d_hid_p, d_out_p)),           # W2 (resident)
                _resident_spec((1, d_out_p)),                 # b2 (f32)
            ],
            out_specs=pl.BlockSpec((tm, d_out_p), lambda i: (i, 0)),
        ),
        compiler_params=pltpu.CompilerParams(
            dimension_semantics=("parallel",),   # shard row tiles across TCs (v7x)
            vmem_limit_bytes=vmem_limit,
        ),
    )(x_b, w1_p, b1_p, w2_p, b2_p)

    return out_p[:M, :d_out]


# ---------------------------------------------------------------------------
# Init + references
# ---------------------------------------------------------------------------
def xavier_normal(key, shape):
    # nn.init.xavier_normal_ on a [out, in] weight: std = sqrt(2/(fan_in+fan_out))
    fan_out, fan_in = shape
    std = (2.0 / (fan_in + fan_out)) ** 0.5
    return std * jax.random.normal(key, shape, dtype=jnp.float32)


def init_mlp_params(key, d_in, d_hid, d_out, n_layers=2):
    # Matches the PyTorch module defaults: 2 Linear layers, xavier_normal
    # weights, zero biases, relu activation, dropout=0.0.
    assert n_layers == 2
    k1, k2 = jax.random.split(key, 2)
    w1 = jnp.asarray(xavier_normal(k1, (d_hid, d_in)).T)   # [in, out] for the kernel
    w2 = jnp.asarray(xavier_normal(k2, (d_out, d_hid)).T)
    b1 = jnp.zeros((d_hid,), jnp.float32)
    b2 = jnp.zeros((d_out,), jnp.float32)
    return w1, b1, w2, b2


def mlp_reference_bf16(x, w1, b1, w2, b2):
    # Mirrors the kernel's numerics: bf16 operands, f32 accumulation.
    xb, w1b, w2b = (a.astype(jnp.bfloat16) for a in (x, w1, w2))
    h = jnp.maximum(jnp.dot(xb, w1b, preferred_element_type=jnp.float32) + b1, 0.0)
    return jnp.dot(h.astype(jnp.bfloat16), w2b,
                   preferred_element_type=jnp.float32) + b2


if __name__ == "__main__":
    d_in, d_hid, d_out = 32, 64, 16
    M = 256

    key = jax.random.PRNGKey(0)
    kx, kp = jax.random.split(key)
    x = jax.random.normal(kx, (M, d_in), dtype=jnp.float32)
    w1, b1, w2, b2 = init_mlp_params(kp, d_in, d_hid, d_out)

    # One-time prepare (pad + cast weights), then a jitted end-to-end forward.
    w1_p, b1_p, w2_p, b2_p, d_out_real = prepare_mlp_params(w1, b1, w2, b2)
    fwd = jax.jit(lambda xx: mlp_forward(xx, w1_p, b1_p, w2_p, b2_p, d_out_real))

    out = jax.block_until_ready(fwd(x))
    assert out.shape == (M, d_out)

    # Exact-semantics reference (bf16 operands, f32 accumulation).
    ref_bf16 = mlp_reference_bf16(x, w1, b1, w2, b2)
    assert jnp.allclose(out, ref_bf16, atol=1e-2, rtol=1e-2), \
        float(jnp.max(jnp.abs(out - ref_bf16)))

    # Loose check against the pure-f32 PyTorch-semantics forward.
    ref_f32 = jnp.maximum(x @ w1 + b1, 0.0) @ w2 + b2
    assert jnp.allclose(out, ref_f32, atol=1e-1, rtol=1e-1)

    print("KERNEL_OK")
</pallas_src>

<mosaic_0001>
module attributes {stable_mosaic.version = 11 : i64} {
  func.func @mlp_fused_kernel(%arg0: i32, %arg1: memref<256x32xbf16, #tpu.memory_space<vmem>>, %arg2: memref<32x128xbf16, #tpu.memory_space<vmem>>, %arg3: memref<1x128xf32, #tpu.memory_space<vmem>>, %arg4: memref<128x128xbf16, #tpu.memory_space<vmem>>, %arg5: memref<1x128xf32, #tpu.memory_space<vmem>>, %arg6: memref<256x128xf32, #tpu.memory_space<vmem>>) attributes {dimension_semantics = [#tpu.dimension_semantics<parallel>], iteration_bounds = array<i64: 1>, scalar_prefetch = 0 : i64, scratch_operands = 0 : i64, tpu.core_type = #tpu.core_type<tc>, window_params = [{transform_indices = @transform_0, window_bounds = array<i64: 256, 32>}, {pipeline_mode = #tpu.pipeline_mode<synchronous>, transform_indices = @transform_1, window_bounds = array<i64: 32, 128>}, {pipeline_mode = #tpu.pipeline_mode<synchronous>, transform_indices = @transform_2, window_bounds = array<i64: 1, 128>}, {pipeline_mode = #tpu.pipeline_mode<synchronous>, transform_indices = @transform_3, window_bounds = array<i64: 128, 128>}, {pipeline_mode = #tpu.pipeline_mode<synchronous>, transform_indices = @transform_4, window_bounds = array<i64: 1, 128>}, {transform_indices = @transform_5, window_bounds = array<i64: 256, 128>}]} {
    %c0 = arith.constant 0 : index
    %c0_0 = arith.constant 0 : index
    %0 = vector.load %arg1[%c0, %c0_0] : memref<256x32xbf16, #tpu.memory_space<vmem>>, vector<256x32xbf16>
    %c0_1 = arith.constant 0 : index
    %c0_2 = arith.constant 0 : index
    %1 = vector.load %arg2[%c0_1, %c0_2] : memref<32x128xbf16, #tpu.memory_space<vmem>>, vector<32x128xbf16>
    %cst = arith.constant dense<0.000000e+00> : vector<256x128xf32>
    %2 = tpu.matmul %0, %1, %cst {dimension_numbers = #tpu.dot_dimension_numbers<[1], [0], [0], [1], [0, 0, 1, 1], [], []>} : vector<256x32xbf16>, vector<32x128xbf16>, vector<256x128xf32> -> vector<256x128xf32>
    %c0_3 = arith.constant 0 : index
    %c0_4 = arith.constant 0 : index
    %3 = vector.load %arg3[%c0_3, %c0_4] : memref<1x128xf32, #tpu.memory_space<vmem>>, vector<1x128xf32>
    %4 = vector.broadcast %3 : vector<1x128xf32> to vector<256x128xf32>
    %5 = arith.addf %2, %4 : vector<256x128xf32>
    %cst_5 = arith.constant 0.000000e+00 : f32
    %6 = vector.broadcast %cst_5 : f32 to vector<256x128xf32>
    %7 = arith.maximumf %5, %6 : vector<256x128xf32>
    %8 = arith.truncf %7 : vector<256x128xf32> to vector<256x128xbf16>
    %c0_6 = arith.constant 0 : index
    %c0_7 = arith.constant 0 : index
    %9 = vector.load %arg4[%c0_6, %c0_7] : memref<128x128xbf16, #tpu.memory_space<vmem>>, vector<128x128xbf16>
    %cst_8 = arith.constant dense<0.000000e+00> : vector<256x128xf32>
    %10 = tpu.matmul %8, %9, %cst_8 {dimension_numbers = #tpu.dot_dimension_numbers<[1], [0], [0], [1], [0, 0, 1, 1], [], []>} : vector<256x128xbf16>, vector<128x128xbf16>, vector<256x128xf32> -> vector<256x128xf32>
    %c0_9 = arith.constant 0 : index
    %c0_10 = arith.constant 0 : index
    %11 = vector.load %arg5[%c0_9, %c0_10] : memref<1x128xf32, #tpu.memory_space<vmem>>, vector<1x128xf32>
    %12 = vector.broadcast %11 : vector<1x128xf32> to vector<256x128xf32>
    %13 = arith.addf %10, %12 : vector<256x128xf32>
    %c0_11 = arith.constant 0 : index
    %c0_12 = arith.constant 0 : index
    %14 = vector.load %arg6[%c0_11, %c0_12] : memref<256x128xf32, #tpu.memory_space<vmem>>, vector<256x128xf32>
    tpu.vector_store %arg6[%c0_11, %c0_12], %13 {strides = array<i32>} : memref<256x128xf32, #tpu.memory_space<vmem>>, vector<256x128xf32>,
    return
  }
  func.func @transform_0(%arg0: i32) -> (i32, i32) {
    %c0_i32 = arith.constant 0 : i32
    %c0_i32_0 = arith.constant 0 : i32
    return %arg0, %c0_i32 : i32, i32
  }
  func.func @transform_1(%arg0: i32) -> (i32, i32) {
    %c0_i32 = arith.constant 0 : i32
    %c0_i32_0 = arith.constant 0 : i32
    %c0_i32_1 = arith.constant 0 : i32
    return %c0_i32, %c0_i32_0 : i32, i32
  }
  func.func @transform_2(%arg0: i32) -> (i32, i32) {
    %c0_i32 = arith.constant 0 : i32
    %c0_i32_0 = arith.constant 0 : i32
    %c0_i32_1 = arith.constant 0 : i32
    return %c0_i32, %c0_i32_0 : i32, i32
  }
  func.func @transform_3(%arg0: i32) -> (i32, i32) {
    %c0_i32 = arith.constant 0 : i32
    %c0_i32_0 = arith.constant 0 : i32
    %c0_i32_1 = arith.constant 0 : i32
    return %c0_i32, %c0_i32_0 : i32, i32
  }
  func.func @transform_4(%arg0: i32) -> (i32, i32) {
    %c0_i32 = arith.constant 0 : i32
    %c0_i32_0 = arith.constant 0 : i32
    %c0_i32_1 = arith.constant 0 : i32
    return %c0_i32, %c0_i32_0 : i32, i32
  }
  func.func @transform_5(%arg0: i32) -> (i32, i32) {
    %c0_i32 = arith.constant 0 : i32
    %c0_i32_0 = arith.constant 0 : i32
    return %arg0, %c0_i32 : i32, i32
  }
}

</mosaic_0001>

<bundles_post_ra>
// kernel: _lambda_.1
= control target key start
LH: loop header
LB: loop body
LE: loop exit
PB: predicated region body
PF: predicated region fallthrough
CT: control target
= control target key end

     0   :  { %vm156_vm0 = vcmask 261120   ;;  %s1188_s1 = inlined_call_operand.vmem [shape: bf16[32,128], index: 1, kind: input, shape index: {}]   ;;  %s1189_s0 = inlined_call_operand.vmem [shape: bf16[256,32], index: 0, kind: input, shape index: {}]   ;;  %s1190_s3 = inlined_call_operand.vmem [shape: bf16[128,128], index: 3, kind: input, shape index: {}]   ;;  %s1191_s2 = inlined_call_operand.vmem [shape: f32[1,128], index: 2, kind: input, shape index: {}, may-alias: {2,4}]   ;;  %s1192_s4 = inlined_call_operand.vmem [shape: f32[1,128], index: 4, kind: input, shape index: {}, may-alias: {2,4}]   ;;  %s1193_s5 = inlined_call_operand.vmem [shape: f32[256,128], index: 5, kind: output, shape index: {}]  }
   0x1   :  { %v868_v0 = vld [vmem:[%s1188_s1] sm:$0xff]   ;;  %v869_v1 = vld [vmem:[%s1188_s1 + $0x8] sm:$0xff]   ;;  %v872_v4 = vld [vmem:[%s1189_s0 + $0x10] sm:$0xff]  }
   0x2   :  { %768 = vmatprep.subr.bf16.mxu0 %v868_v0  ;;  %v870_v2 = vld [vmem:[%s1189_s0] sm:$0xff]   ;;  %v871_v3 = vld [vmem:[%s1189_s0 + $0x8] sm:$0xff]   ;;  %v873_v5 = vld [vmem:[%s1189_s0 + $0x18] sm:$0xff]  }
   0x3   :  { %769 = vmatpush3.bf16.msra.mxu0 %v868_v0  ;;  %772 = vmatprep.mubr.msk.bf16.mxu0 %vm156_vm0, %v870_v2  ;;  %v874_v6 = vld [vmem:[%s1189_s0 + $0x20] sm:$0xff]   ;;  %v887_v8 = vld [vmem:[%s1190_s3 + $0x8] sm:$0xff]   ;;  %v888_v10 = vld [vmem:[%s1190_s3 + $0x10] sm:$0xff]  }
   0x4   :  { %770 = vmatprep.subr.bf16.mxu0 %v869_v1  ;;  %v886_v7 = vld [vmem:[%s1190_s3] sm:$0xff]   ;;  %v875_v9 = vld [vmem:[%s1189_s0 + $0x28] sm:$0xff]   ;;  %v876_v11 = vld [vmem:[%s1189_s0 + $0x30] sm:$0xff]  }
   0x5   :  { %852 = vmatprep.subr.bf16.mxu1 %v886_v7  ;;  %v889_v12 = vld [vmem:[%s1190_s3 + $0x18] sm:$0xff]   ;;  %v890_v14 = vld [vmem:[%s1190_s3 + $0x20] sm:$0xff]   ;;  %v891_v16 = vld [vmem:[%s1190_s3 + $0x28] sm:$0xff]  }
   0x6   :  { %860 = vmatpush3.bf16.msra.mxu1 %v886_v7  ;;  %v877_v13 = vld [vmem:[%s1189_s0 + $0x38] sm:$0xff]   ;;  %v878_v15 = vld [vmem:[%s1189_s0 + $0x40] sm:$0xff]   ;;  %v879_v17 = vld [vmem:[%s1189_s0 + $0x48] sm:$0xff]  }
   0x7   :  { %771 = vmatpush3.bf16.msra.mxu0 %v869_v1  ;;  %853 = vmatprep.subr.bf16.mxu1 %v887_v8  ;;  %v880_v18 = vld [vmem:[%s1189_s0 + $0x50] sm:$0xff]   ;;  %v881_v19 = vld [vmem:[%s1189_s0 + $0x58] sm:$0xff]   ;;  %v882_v20 = vld [vmem:[%s1189_s0 + $0x60] sm:$0xff]  }
   0x8   :  { %804 = vmatprep.subr.bf16.mxu0 %v886_v7  ;;  %v883_v21 = vld [vmem:[%s1189_s0 + $0x68] sm:$0xff]   ;;  %v884_v22 = vld [vmem:[%s1189_s0 + $0x70] sm:$0xff]   ;;  %v885_v23 = vld [vmem:[%s1189_s0 + $0x78] sm:$0xff]  }
   0x9   :  { %v892_v24 = vld [vmem:[%s1190_s3 + $0x30] sm:$0xff]   ;;  %v893_v25 = vld [vmem:[%s1190_s3 + $0x38] sm:$0xff]   ;;  %v1021_v26 = vld [vmem:[%s1191_s2] ss:$0 sm:$0xff] }
   0xa   :  { %773 = vmatmul.mubr.msk.bf16.vlgmr.msra.gmra.mrb[0].mxu0 %vm156_vm0, %v871_v3  ;;  %861 = vmatpush3.bf16.msra.mxu1 %v887_v8 }
   0xb   :  { %776 = vmatprep.mubr.msk.bf16.mxu0 %vm156_vm0, %v872_v4  ;;  %805 = vmatpush3.bf16.msra.mxu0 %v886_v7 }
   0xc   :  { %806 = vmatprep.subr.bf16.mxu0 %v887_v8  ;;  %854 = vmatprep.subr.bf16.mxu1 %v888_v10 }
   0xe   :  { %862 = vmatpush3.bf16.msra.mxu1 %v888_v10 }
   0xf   :  { %807 = vmatpush3.bf16.msra.mxu0 %v887_v8  ;;  %855 = vmatprep.subr.bf16.mxu1 %v889_v12 }
  0x10   :  { %808 = vmatprep.subr.bf16.mxu0 %v888_v10 }
  0x12   :  { %777 = vmatmul.mubr.msk.bf16.gmra.mrb[4].mxu0 %vm156_vm0, %v873_v5  ;;  %863 = vmatpush3.bf16.msra.mxu1 %v889_v12 }
  0x13   :  { %780 = vmatprep.mubr.msk.bf16.mxu0 %vm156_vm0, %v874_v6  ;;  %809 = vmatpush3.bf16.msra.mxu0 %v888_v10 }
  0x14   :  { %810 = vmatprep.subr.bf16.mxu0 %v889_v12  ;;  %856 = vmatprep.subr.bf16.mxu1 %v890_v14 }
  0x16   :  { %864 = vmatpush3.bf16.msra.mxu1 %v890_v14 }
  0x17   :  { %811 = vmatpush3.bf16.msra.mxu0 %v889_v12  ;;  %857 = vmatprep.subr.bf16.mxu1 %v891_v16 }
  0x18   :  { %812 = vmatprep.subr.bf16.mxu0 %v890_v14 }
  0x1a   :  { %781 = vmatmul.mubr.msk.bf16.gmra.mrb[8].mxu0 %vm156_vm0, %v875_v9  ;;  %865 = vmatpush3.bf16.msra.mxu1 %v891_v16 }
  0x1b   :  { %784 = vmatprep.mubr.msk.bf16.mxu0 %vm156_vm0, %v876_v11  ;;  %813 = vmatpush3.bf16.msra.mxu0 %v890_v14 }
  0x1c   :  { %814 = vmatprep.subr.bf16.mxu0 %v891_v16  ;;  %858 = vmatprep.subr.bf16.mxu1 %v892_v24 }
  0x1e   :  { %866 = vmatpush3.bf16.msra.mxu1 %v892_v24 }
  0x1f   :  { %815 = vmatpush3.bf16.msra.mxu0 %v891_v16  ;;  %859 = vmatprep.subr.bf16.mxu1 %v893_v25 }
  0x20   :  { %816 = vmatprep.subr.bf16.mxu0 %v892_v24 }
  0x22   :  { %785 = vmatmul.mubr.msk.bf16.gmra.mrb[12].mxu0 %vm156_vm0, %v877_v13  ;;  %867 = vmatpush3.bf16.msra.mxu1 %v893_v25 }
  0x23   :  { %788 = vmatprep.mubr.msk.bf16.mxu0 %vm156_vm0, %v878_v15  ;;  %817 = vmatpush3.bf16.msra.mxu0 %v892_v24 }
  0x24   :  { %818 = vmatprep.subr.bf16.mxu0 %v893_v25 }
  0x27   :  { %819 = vmatpush3.bf16.msra.mxu0 %v893_v25 }
  0x2a   :  { %789 = vmatmul.mubr.msk.bf16.gmra.mrb[16].mxu0 %vm156_vm0, %v879_v17 }
  0x2b   :  { %792 = vmatprep.mubr.msk.bf16.mxu0 %vm156_vm0, %v880_v18 }
  0x32   :  { %793 = vmatmul.mubr.msk.bf16.gmra.mrb[20].mxu0 %vm156_vm0, %v881_v19 }
  0x33   :  { %796 = vmatprep.mubr.msk.bf16.mxu0 %vm156_vm0, %v882_v20 }
  0x3a   :  { %797 = vmatmul.mubr.msk.bf16.gmra.mrb[24].mxu0 %vm156_vm0, %v883_v21 }
  0x3b   :  { %800 = vmatprep.mubr.msk.bf16.mxu0 %vm156_vm0, %v884_v22 }
  0x42   :  { %801 = vmatmul.mubr.msk.bf16.gmra.mrb[28].mxu0 %vm156_vm0, %v885_v23 }
  0xdd   :  { %v774_v27 = vpop.f32.mrb[0].mxu0 }
  0xde   :  { %v248_v28 = vadd.f32 %v774_v27, %v1021_v26  ;;  %v239_v29 = vpop.f32.mrb[1].mxu0 }
  0xdf   :  { %v240_v30 = vadd.f32 %v1021_v26, %v239_v29  ;;  %v775_v31 = vpop.f32.mrb[2].mxu0 }
  0xe0   :  { %v251_v32 = vadd.f32 %v775_v31, %v1021_v26  ;;  %v242_v33 = vpop.f32.mrb[3].mxu0  ;;  %v368_v35 = vmax.f32 %v248_v28, 0.0 }
  0xe1   :  { %v243_v34 = vadd.f32 %v1021_v26, %v242_v33  ;;  %v366_v37 = vmax.f32 %v240_v30, 0.0 }
  0xe2   :  { %v369_v36 = vmax.f32 %v251_v32, 0.0 }
  0xe3   :  { %v367_v38 = vmax.f32 %v243_v34, 0.0 }
  0xe4   :  { %v399_v39 = vpack.c.bf16 %v369_v36, %v368_v35 }
  0xe5   :  { %v398_v40 = vpack.c.bf16 %v367_v38, %v366_v37  ;;  %v778_v41 = vpop.f32.mrb[4].mxu0 }
  0xe6   :  { %v264_v42 = vadd.f32 %v778_v41, %v1021_v26  ;;  %v255_v43 = vpop.f32.mrb[5].mxu0 }
  0xe7   :  { %v256_v44 = vadd.f32 %v1021_v26, %v255_v43  ;;  %v779_v45 = vpop.f32.mrb[6].mxu0  ;;  %820 = vmatprep.mubr.bf16.mxu0 %v398_v40 }
  0xe8   :  { %v267_v46 = vadd.f32 %v779_v45, %v1021_v26  ;;  %v258_v47 = vpop.f32.mrb[7].mxu0  ;;  %821 = vmatmul.mubr.bf16.vlgmr.msra.gmra.mrb[32].mxu0 %v399_v39  ;;  %v372_v49 = vmax.f32 %v264_v42, 0.0 }
  0xe9   :  { %v259_v48 = vadd.f32 %v1021_v26, %v258_v47  ;;  %v370_v51 = vmax.f32 %v256_v44, 0.0 }
  0xea   :  { %v373_v50 = vmax.f32 %v267_v46, 0.0 }
  0xeb   :  { %v371_v52 = vmax.f32 %v259_v48, 0.0 }
  0xec   :  { %v401_v53 = vpack.c.bf16 %v373_v50, %v372_v49 }
  0xed   :  { %v782_v54 = vpop.f32.mrb[8].mxu0  ;;  %v400_v55 = vpack.c.bf16 %v371_v52, %v370_v51 }
  0xee   :  { %v280_v56 = vadd.f32 %v782_v54, %v1021_v26  ;;  %v271_v57 = vpop.f32.mrb[9].mxu0 }
  0xef   :  { %v272_v58 = vadd.f32 %v1021_v26, %v271_v57  ;;  %v783_v59 = vpop.f32.mrb[10].mxu0  ;;  %824 = vmatprep.mubr.bf16.mxu1 %v400_v55 }
  0xf0   :  { %v283_v60 = vadd.f32 %v783_v59, %v1021_v26  ;;  %v274_v61 = vpop.f32.mrb[11].mxu0  ;;  %825 = vmatmul.mubr.bf16.vlgmr.msra.gmra.mrb[0].mxu1 %v401_v53  ;;  %v376_v63 = vmax.f32 %v280_v56, 0.0 }
  0xf1   :  { %v275_v62 = vadd.f32 %v1021_v26, %v274_v61  ;;  %v374_v1 = vmax.f32 %v272_v58, 0.0 }
  0xf2   :  { %v377_v0 = vmax.f32 %v283_v60, 0.0 }
  0xf3   :  { %v375_v2 = vmax.f32 %v275_v62, 0.0 }
  0xf4   :  { %v403_v3 = vpack.c.bf16 %v377_v0, %v376_v63 }
  0xf5   :  { %v402_v4 = vpack.c.bf16 %v375_v2, %v374_v1  ;;  %v786_v5 = vpop.f32.mrb[12].mxu0 }
  0xf6   :  { %v296_v6 = vadd.f32 %v786_v5, %v1021_v26  ;;  %v287_v7 = vpop.f32.mrb[13].mxu0 }
  0xf7   :  { %v288_v8 = vadd.f32 %v1021_v26, %v287_v7  ;;  %v787_v9 = vpop.f32.mrb[14].mxu0  ;;  %828 = vmatprep.mubr.bf16.mxu1 %v402_v4 }
  0xf8   :  { %v299_v10 = vadd.f32 %v787_v9, %v1021_v26  ;;  %v290_v11 = vpop.f32.mrb[15].mxu0  ;;  %829 = vmatmul.mubr.bf16.gmra.mrb[4].mxu1 %v403_v3  ;;  %v380_v13 = vmax.f32 %v296_v6, 0.0 }
  0xf9   :  { %v291_v12 = vadd.f32 %v1021_v26, %v290_v11  ;;  %v378_v15 = vmax.f32 %v288_v8, 0.0 }
  0xfa   :  { %v381_v14 = vmax.f32 %v299_v10, 0.0 }
  0xfb   :  { %v379_v16 = vmax.f32 %v291_v12, 0.0  ;;  %v1058_v12 = vld [vmem:[%s1192_s4] ss:$0 sm:$0xff] }
  0xfc   :  { %v405_v17 = vpack.c.bf16 %v381_v14, %v380_v13 }
  0xfd   :  { %v404_v18 = vpack.c.bf16 %v379_v16, %v378_v15  ;;  %v790_v19 = vpop.f32.mrb[16].mxu0 }
  0xfe   :  { %v312_v20 = vadd.f32 %v790_v19, %v1021_v26  ;;  %v303_v21 = vpop.f32.mrb[17].mxu0 }
  0xff   :  { %v304_v22 = vadd.f32 %v1021_v26, %v303_v21  ;;  %v791_v23 = vpop.f32.mrb[18].mxu0  ;;  %832 = vmatprep.mubr.bf16.mxu1 %v404_v18 }
 0x100   :  { %v315_v24 = vadd.f32 %v791_v23, %v1021_v26  ;;  %v306_v25 = vpop.f32.mrb[19].mxu0  ;;  %833 = vmatmul.mubr.bf16.gmra.mrb[8].mxu1 %v405_v17  ;;  %v384_v28 = vmax.f32 %v312_v20, 0.0 }
 0x101   :  { %v307_v27 = vadd.f32 %v1021_v26, %v306_v25  ;;  %v382_v30 = vmax.f32 %v304_v22, 0.0 }
 0x102   :  { %v385_v29 = vmax.f32 %v315_v24, 0.0 }
 0x103   :  { %v383_v31 = vmax.f32 %v307_v27, 0.0 }
 0x104   :  { %v407_v32 = vpack.c.bf16 %v385_v29, %v384_v28 }
 0x105   :  { %v406_v33 = vpack.c.bf16 %v383_v31, %v382_v30  ;;  %v794_v34 = vpop.f32.mrb[20].mxu0 }
 0x106   :  { %v328_v35 = vadd.f32 %v794_v34, %v1021_v26  ;;  %v319_v36 = vpop.f32.mrb[21].mxu0 }
 0x107   :  { %v320_v37 = vadd.f32 %v1021_v26, %v319_v36  ;;  %v795_v38 = vpop.f32.mrb[22].mxu0  ;;  %836 = vmatprep.mubr.bf16.mxu1 %v406_v33 }
 0x108   :  { %v331_v39 = vadd.f32 %v795_v38, %v1021_v26  ;;  %v322_v40 = vpop.f32.mrb[23].mxu0  ;;  %837 = vmatmul.mubr.bf16.gmra.mrb[12].mxu1 %v407_v32  ;;  %v388_v42 = vmax.f32 %v328_v35, 0.0 }
 0x109   :  { %v323_v41 = vadd.f32 %v1021_v26, %v322_v40  ;;  %v386_v44 = vmax.f32 %v320_v37, 0.0 }
 0x10a   :  { %v389_v43 = vmax.f32 %v331_v39, 0.0 }
 0x10b   :  { %v387_v45 = vmax.f32 %v323_v41, 0.0 }
 0x10c   :  { %v409_v46 = vpack.c.bf16 %v389_v43, %v388_v42 }
 0x10d   :  { %v408_v47 = vpack.c.bf16 %v387_v45, %v386_v44  ;;  %v798_v48 = vpop.f32.mrb[24].mxu0 }
 0x10e   :  { %v344_v49 = vadd.f32 %v798_v48, %v1021_v26  ;;  %v335_v50 = vpop.f32.mrb[25].mxu0 }
 0x10f   :  { %v336_v51 = vadd.f32 %v1021_v26, %v335_v50  ;;  %v799_v52 = vpop.f32.mrb[26].mxu0  ;;  %840 = vmatprep.mubr.bf16.mxu1 %v408_v47 }
 0x110   :  { %v347_v53 = vadd.f32 %v799_v52, %v1021_v26  ;;  %v338_v54 = vpop.f32.mrb[27].mxu0  ;;  %841 = vmatmul.mubr.bf16.gmra.mrb[16].mxu1 %v409_v46  ;;  %v392_v56 = vmax.f32 %v344_v49, 0.0 }
 0x111   :  { %v339_v55 = vadd.f32 %v1021_v26, %v338_v54  ;;  %v390_v58 = vmax.f32 %v336_v51, 0.0 }
 0x112   :  { %v393_v57 = vmax.f32 %v347_v53, 0.0 }
 0x113   :  { %v391_v59 = vmax.f32 %v339_v55, 0.0 }
 0x114   :  { %v411_v60 = vpack.c.bf16 %v393_v57, %v392_v56 }
 0x115   :  { %v410_v61 = vpack.c.bf16 %v391_v59, %v390_v58  ;;  %v802_v62 = vpop.f32.mrb[28].mxu0 }
 0x116   :  { %v360_v63 = vadd.f32 %v802_v62, %v1021_v26  ;;  %v351_v0 = vpop.f32.mrb[29].mxu0 }
 0x117   :  { %v352_v1 = vadd.f32 %v1021_v26, %v351_v0  ;;  %v803_v2 = vpop.f32.mrb[30].mxu0  ;;  %844 = vmatprep.mubr.bf16.mxu1 %v410_v61 }
 0x118   :  { %v363_v3 = vadd.f32 %v803_v2, %v1021_v26  ;;  %v354_v4 = vpop.f32.mrb[31].mxu0  ;;  %845 = vmatmul.mubr.bf16.gmra.mrb[20].mxu1 %v411_v60  ;;  %v396_v6 = vmax.f32 %v360_v63, 0.0 }
 0x119   :  { %v355_v5 = vadd.f32 %v1021_v26, %v354_v4  ;;  %v394_v8 = vmax.f32 %v352_v1, 0.0 }
 0x11a   :  { %v397_v7 = vmax.f32 %v363_v3, 0.0 }
 0x11b   :  { %v395_v9 = vmax.f32 %v355_v5, 0.0 }
 0x11c   :  { %v413_v10 = vpack.c.bf16 %v397_v7, %v396_v6 }
 0x11d   :  { %v412_v11 = vpack.c.bf16 %v395_v9, %v394_v8 }
 0x11f   :  { %848 = vmatprep.mubr.bf16.mxu1 %v412_v11 }
 0x120   :  { %849 = vmatmul.mubr.bf16.gmra.mrb[24].mxu1 %v413_v10 }
 0x1bb   :  { %v822_v13 = vpop.f32.mrb[32].mxu0 }
 0x1bc   :  { %v528_v14 = vadd.f32 %v822_v13, %v1058_v12  ;;  %v519_v15 = vpop.f32.mrb[33].mxu0 }
 0x1bd   :  { %v520_v16 = vadd.f32 %v1058_v12, %v519_v15  ;;  %v823_v26 = vpop.f32.mrb[34].mxu0 }
 0x1be   :  { %648 = vst [vmem:[%s1193_s5 + $0x10] sm:$0xff] %v528_v14  ;;  %v531_v17 = vadd.f32 %v823_v26, %v1058_v12  ;;  %v522_v18 = vpop.f32.mrb[35].mxu0 }
 0x1bf   :  { %646 = vst [vmem:[%s1193_s5] sm:$0xff] %v520_v16  ;;  %v523_v19 = vadd.f32 %v1058_v12, %v522_v18 }
 0x1c0   :  { %649 = vst [vmem:[%s1193_s5 + $0x18] sm:$0xff] %v531_v17 }
 0x1c1   :  { %647 = vst [vmem:[%s1193_s5 + $0x8] sm:$0xff] %v523_v19 }
 0x1c3   :  { %v826_v20 = vpop.f32.mrb[0].mxu1 }
 0x1c4   :  { %v544_v21 = vadd.f32 %v826_v20, %v1058_v12  ;;  %v535_v22 = vpop.f32.mrb[1].mxu1 }
 0x1c5   :  { %v536_v23 = vadd.f32 %v1058_v12, %v535_v22  ;;  %v827_v24 = vpop.f32.mrb[2].mxu1 }
 0x1c6   :  { %652 = vst [vmem:[%s1193_s5 + $0x30] sm:$0xff] %v544_v21  ;;  %v547_v25 = vadd.f32 %v827_v24, %v1058_v12  ;;  %v538_v27 = vpop.f32.mrb[3].mxu1 }
 0x1c7   :  { %650 = vst [vmem:[%s1193_s5 + $0x20] sm:$0xff] %v536_v23  ;;  %v539_v28 = vadd.f32 %v1058_v12, %v538_v27 }
 0x1c8   :  { %653 = vst [vmem:[%s1193_s5 + $0x38] sm:$0xff] %v547_v25 }
 0x1c9   :  { %651 = vst [vmem:[%s1193_s5 + $0x28] sm:$0xff] %v539_v28 }
 0x1cb   :  { %v830_v29 = vpop.f32.mrb[4].mxu1 }
 0x1cc   :  { %v560_v30 = vadd.f32 %v830_v29, %v1058_v12  ;;  %v551_v31 = vpop.f32.mrb[5].mxu1 }
 0x1cd   :  { %v552_v32 = vadd.f32 %v1058_v12, %v551_v31  ;;  %v831_v33 = vpop.f32.mrb[6].mxu1 }
 0x1ce   :  { %656 = vst [vmem:[%s1193_s5 + $0x50] sm:$0xff] %v560_v30  ;;  %v563_v34 = vadd.f32 %v831_v33, %v1058_v12  ;;  %v554_v35 = vpop.f32.mrb[7].mxu1 }
 0x1cf   :  { %654 = vst [vmem:[%s1193_s5 + $0x40] sm:$0xff] %v552_v32  ;;  %v555_v36 = vadd.f32 %v1058_v12, %v554_v35 }
 0x1d0   :  { %657 = vst [vmem:[%s1193_s5 + $0x58] sm:$0xff] %v563_v34 }
 0x1d1   :  { %655 = vst [vmem:[%s1193_s5 + $0x48] sm:$0xff] %v555_v36 }
 0x1d3   :  { %v834_v37 = vpop.f32.mrb[8].mxu1 }
 0x1d4   :  { %v576_v38 = vadd.f32 %v834_v37, %v1058_v12  ;;  %v567_v39 = vpop.f32.mrb[9].mxu1 }
 0x1d5   :  { %v568_v40 = vadd.f32 %v1058_v12, %v567_v39  ;;  %v835_v41 = vpop.f32.mrb[10].mxu1 }
 0x1d6   :  { %660 = vst [vmem:[%s1193_s5 + $0x70] sm:$0xff] %v576_v38  ;;  %v579_v42 = vadd.f32 %v835_v41, %v1058_v12  ;;  %v570_v43 = vpop.f32.mrb[11].mxu1 }
 0x1d7   :  { %658 = vst [vmem:[%s1193_s5 + $0x60] sm:$0xff] %v568_v40  ;;  %v571_v44 = vadd.f32 %v1058_v12, %v570_v43 }
 0x1d8   :  { %661 = vst [vmem:[%s1193_s5 + $0x78] sm:$0xff] %v579_v42 }
 0x1d9   :  { %659 = vst [vmem:[%s1193_s5 + $0x68] sm:$0xff] %v571_v44 }
 0x1db   :  { %v838_v45 = vpop.f32.mrb[12].mxu1 }
 0x1dc   :  { %v592_v46 = vadd.f32 %v838_v45, %v1058_v12  ;;  %v583_v47 = vpop.f32.mrb[13].mxu1 }
 0x1dd   :  { %v584_v48 = vadd.f32 %v1058_v12, %v583_v47  ;;  %v839_v49 = vpop.f32.mrb[14].mxu1 }
 0x1de   :  { %664 = vst [vmem:[%s1193_s5 + $0x90] sm:$0xff] %v592_v46  ;;  %v595_v50 = vadd.f32 %v839_v49, %v1058_v12  ;;  %v586_v51 = vpop.f32.mrb[15].mxu1 }
 0x1df   :  { %662 = vst [vmem:[%s1193_s5 + $0x80] sm:$0xff] %v584_v48  ;;  %v587_v52 = vadd.f32 %v1058_v12, %v586_v51 }
 0x1e0   :  { %665 = vst [vmem:[%s1193_s5 + $0x98] sm:$0xff] %v595_v50 }
 0x1e1   :  { %663 = vst [vmem:[%s1193_s5 + $0x88] sm:$0xff] %v587_v52 }
 0x1e3   :  { %v842_v53 = vpop.f32.mrb[16].mxu1 }
 0x1e4   :  { %v608_v54 = vadd.f32 %v842_v53, %v1058_v12  ;;  %v599_v55 = vpop.f32.mrb[17].mxu1 }
 0x1e5   :  { %v600_v56 = vadd.f32 %v1058_v12, %v599_v55  ;;  %v843_v57 = vpop.f32.mrb[18].mxu1 }
 0x1e6   :  { %668 = vst [vmem:[%s1193_s5 + $0xb0] sm:$0xff] %v608_v54  ;;  %v611_v58 = vadd.f32 %v843_v57, %v1058_v12  ;;  %v602_v59 = vpop.f32.mrb[19].mxu1 }
 0x1e7   :  { %666 = vst [vmem:[%s1193_s5 + $0xa0] sm:$0xff] %v600_v56  ;;  %v603_v60 = vadd.f32 %v1058_v12, %v602_v59 }
 0x1e8   :  { %669 = vst [vmem:[%s1193_s5 + $0xb8] sm:$0xff] %v611_v58 }
 0x1e9   :  { %667 = vst [vmem:[%s1193_s5 + $0xa8] sm:$0xff] %v603_v60 }
 0x1eb   :  { %v846_v61 = vpop.f32.mrb[20].mxu1 }
 0x1ec   :  { %v624_v62 = vadd.f32 %v846_v61, %v1058_v12  ;;  %v615_v63 = vpop.f32.mrb[21].mxu1 }
 0x1ed   :  { %v616_v0 = vadd.f32 %v1058_v12, %v615_v63  ;;  %v847_v1 = vpop.f32.mrb[22].mxu1 }
 0x1ee   :  { %672 = vst [vmem:[%s1193_s5 + $0xd0] sm:$0xff] %v624_v62  ;;  %v627_v2 = vadd.f32 %v847_v1, %v1058_v12  ;;  %v618_v3 = vpop.f32.mrb[23].mxu1 }
 0x1ef   :  { %670 = vst [vmem:[%s1193_s5 + $0xc0] sm:$0xff] %v616_v0  ;;  %v619_v4 = vadd.f32 %v1058_v12, %v618_v3 }
 0x1f0   :  { %673 = vst [vmem:[%s1193_s5 + $0xd8] sm:$0xff] %v627_v2 }
 0x1f1   :  { %671 = vst [vmem:[%s1193_s5 + $0xc8] sm:$0xff] %v619_v4 }
 0x1f3   :  { %v850_v5 = vpop.f32.mrb[24].mxu1 }
 0x1f4   :  { %v640_v6 = vadd.f32 %v850_v5, %v1058_v12  ;;  %v631_v7 = vpop.f32.mrb[25].mxu1 }
 0x1f5   :  { %v632_v8 = vadd.f32 %v1058_v12, %v631_v7  ;;  %v851_v9 = vpop.f32.mrb[26].mxu1 }
 0x1f6   :  { %676 = vst [vmem:[%s1193_s5 + $0xf0] sm:$0xff] %v640_v6  ;;  %v643_v10 = vadd.f32 %v851_v9, %v1058_v12  ;;  %v634_v11 = vpop.f32.mrb[27].mxu1 }
 0x1f7   :  { %674 = vst [vmem:[%s1193_s5 + $0xe0] sm:$0xff] %v632_v8  ;;  %v635_v13 = vadd.f32 %v1058_v12, %v634_v11 }
 0x1f8   :  { %677 = vst [vmem:[%s1193_s5 + $0xf8] sm:$0xff] %v643_v10 }
 0x1f9   :  { %675 = vst [vmem:[%s1193_s5 + $0xe8] sm:$0xff] %v635_v13 }

</bundles_post_ra>
